<compile_context>
chip_gen: v5e
topology: v5e:2x2
jax: 0.10.0
libtpu: 0.0.40
codegen_flags: <defaults>
</compile_context>

<pallas_src>
import math

import jax
import jax.numpy as jnp
from jax.experimental import pallas as pl
from jax.experimental.pallas import tpu as pltpu


# ---------------------------------------------------------------------------
# Buffer setup (matches RotaryPositionalEmbedding._compute_cos_sin_cache)
# ---------------------------------------------------------------------------
def compute_cos_sin_cache(max_seq_len: int, dim: int, base: int = 10000):
    assert dim % 2 == 0, "Dimension must be even for rotary embeddings"
    position = jnp.arange(max_seq_len, dtype=jnp.float32)[:, None]        # (S, 1)
    dim_indices = jnp.arange(0, dim, 2, dtype=jnp.float32) / dim          # (D/2,)
    theta = position * jnp.exp(-dim_indices * math.log(base))             # (S, D/2)
    cos = jnp.repeat(jnp.cos(theta), 2, axis=1)                           # (S, D)
    sin = jnp.repeat(jnp.sin(theta), 2, axis=1)                           # (S, D)
    return cos, sin


# ---------------------------------------------------------------------------
# rotate_half as a signed permutation matrix:  rotate_half(x) == x @ P
#   out[:, j]        = -x[:, 2j+1]   for j <  D/2
#   out[:, D/2 + j]  =  x[:, 2j]     for j <  D/2
# ---------------------------------------------------------------------------
def _build_perm(dim: int) -> jnp.ndarray:
    half = dim // 2
    row = jnp.arange(dim)[:, None]
    col = jnp.arange(dim)[None, :]
    neg = (col < half) & (row == 2 * col + 1)
    pos = (col >= half) & (row == 2 * (col - half))
    return jnp.where(neg, -1.0, 0.0) + jnp.where(pos, 1.0, 0.0)           # (D, D) f32


def _divisors_desc(n: int):
    return [d for d in range(n, 0, -1) if n % d == 0]


# ---------------------------------------------------------------------------
# Kernels
# ---------------------------------------------------------------------------
def rope_kernel_slabs(cos_ref, sin_ref, p_ref, q_ref, k_ref, qo_ref, ko_ref):
    """Optimized path: q/k/out blocks are (tbh, TR, L); one (TR, L) f32 cos/sin
    block is shared by every fused (b, h) slab (no HBM replication)."""
    cos = cos_ref[...]                     # (TR, L) float32
    sin = sin_ref[...]                     # (TR, L) float32
    P = p_ref[...]                         # (L, L) signed permutation (+-1)
    tbh = q_ref.shape[0]
    for s in range(tbh):                   # static unroll; tbh is capped small
        q = q_ref[s]                       # (TR, L)
        k = k_ref[s]
        # TODO(synk): on v5e the f32 MXU matmul is emulated; if a bundle dump
        # shows it is not hidden under the DMA there, switch the rotate to a
        # VPU/XLU strided de-interleave for f32 inputs.
        q_rot = jnp.dot(q, P, preferred_element_type=jnp.float32)
        k_rot = jnp.dot(k, P, preferred_element_type=jnp.float32)
        qo_ref[s] = (q.astype(jnp.float32) * cos + q_rot * sin).astype(qo_ref.dtype)
        ko_ref[s] = (k.astype(jnp.float32) * cos + k_rot * sin).astype(ko_ref.dtype)


def rope_kernel_flat(cos_ref, sin_ref, p_ref, q_ref, k_ref, qo_ref, ko_ref):
    """Fallback path for sublane-unaligned slabs: flat 2-D (rows, L) blocks,
    cos/sin pre-tiled to the block (they are tiny on this path)."""
    cos = cos_ref[...]                     # (block_rows, L) float32
    sin = sin_ref[...]
    P = p_ref[...]
    q = q_ref[...]
    k = k_ref[...]
    q_rot = jnp.dot(q, P, preferred_element_type=jnp.float32)
    k_rot = jnp.dot(k, P, preferred_element_type=jnp.float32)
    qo_ref[...] = (q.astype(jnp.float32) * cos + q_rot * sin).astype(qo_ref.dtype)
    ko_ref[...] = (k.astype(jnp.float32) * cos + k_rot * sin).astype(ko_ref.dtype)


# ---------------------------------------------------------------------------
# Wrapper (forward pass).  Call through jax.jit (static seq_len) so the
# permutation / cos-sin prep is compiled & constant-folded once, not per call.
# ---------------------------------------------------------------------------
def rope_forward(q, k, cos_cached, sin_cached, seq_len, *,
                 block_bytes_target: int = 1 * 1024 * 1024,
                 max_fused_slabs: int = 32):
    B, H, S, D = q.shape
    assert k.shape == q.shape
    assert S == seq_len, "q/k seq axis must equal seq_len"
    assert D % 2 == 0

    dtype = q.dtype
    itemsize = jnp.dtype(dtype).itemsize
    sublane = max(8, 32 // itemsize)               # 8 f32, 16 bf16, 32 int8/fp8
    BH = B * H

    # cos/sin stay float32 so the combine matches the f32 reference even for
    # bf16 q/k; cast to the output dtype happens once, at the store.
    cos = cos_cached[:seq_len].astype(jnp.float32)         # (S, D)
    sin = sin_cached[:seq_len].astype(jnp.float32)         # (S, D)
    P = _build_perm(D)                                     # (D, D) f32

    # ---- lane-dense repacking: rows of L lanes, L a multiple of 128 --------
    if D % 128 == 0:
        L, pack = D, 1
    else:
        lcm_dl = D * 128 // math.gcd(D, 128)
        if (S * D) % lcm_dl == 0 and lcm_dl <= 512:
            L, pack = lcm_dl, lcm_dl // D          # covers D = 32/64/96/192/...
        else:
            # TODO(synk): lane-sparse fallback (masked partial stores) for
            # head_dims / seq_lens that do not repack to a 128-lane multiple.
            L, pack = D, 1
    if pack > 1:
        P = jnp.kron(jnp.eye(pack, dtype=jnp.float32), P)  # block-diag (L, L)
    P = P.astype(dtype)                            # +-1/0 exact in bf16 too

    R = (S * D) // L                               # rows per (b, h) slab
    cos2 = cos.reshape(R, L)
    sin2 = sin.reshape(R, L)

    row_bytes = L * itemsize
    slab_bytes = R * row_bytes

    if R % sublane == 0:
        # ------------- optimized path: 3-D (slab, row, lane) blocks ---------
        q_in = q.reshape(BH, R, L)
        k_in = k.reshape(BH, R, L)
        cos_in, sin_in = cos2, sin2

        if slab_bytes <= block_bytes_target:
            # Regime 1: whole slabs per step; fuse several to amortize the
            # ~0.35 us per-step pipeline overhead.
            TR = R
            cap = max(1, min(block_bytes_target // slab_bytes, max_fused_slabs))
            tbh = next(d for d in _divisors_desc(BH) if d <= cap)
            # Keep >= 2 grid steps when possible so v7x's two TensorCores can
            # each take half of the "parallel" grid.
            if BH // tbh < 2 and BH > 1:
                tbh = next(d for d in _divisors_desc(BH) if d <= BH // 2)
        else:
            # Regime 2 (long sequences): one slab per step, tile the rows.
            tbh = 1
            TR = R                                  # full-extent fallback (legal)
            for d in _divisors_desc(R):
                if d * row_bytes <= block_bytes_target and d % sublane == 0:
                    TR = d
                    break

        # Row-block axis OUTER, slab axis INNER: the cos/sin block index only
        # depends on the outer axis, so it is constant across consecutive grid
        # steps and each cos/sin block is DMA'd exactly once (not once per
        # (b, h) slab as before).
        grid = (R // TR, BH // tbh)

        qk_spec = pl.BlockSpec((tbh, TR, L), lambda r, i: (i, r, 0))
        cs_spec = pl.BlockSpec((TR, L), lambda r, i: (r, 0))
        p_spec = pl.BlockSpec((L, L), lambda r, i: (0, 0))

        kernel = rope_kernel_slabs
        dims = ("parallel", "parallel")
        out_shape = (jax.ShapeDtypeStruct((BH, R, L), q.dtype),
                     jax.ShapeDtypeStruct((BH, R, L), k.dtype))
    else:
        # ------------- fallback path: flat 2-D blocks ------------------------
        # Only taken when a slab has a sublane-unaligned row count (tiny / odd
        # shapes).  cos/sin are replicated to one block's rows; they are tiny
        # here, so the extra HBM materialization is negligible.
        q_in = q.reshape(BH * R, L)
        k_in = k.reshape(BH * R, L)

        def pick_tbh(cap_slabs):
            for d in _divisors_desc(BH):
                if d <= cap_slabs and ((d * R) % sublane == 0 or d == BH):
                    return d
            for d in reversed(_divisors_desc(BH)):   # smallest aligned divisor
                if (d * R) % sublane == 0:
                    return d
            return BH                                # full extent (always legal)

        cap = max(1, min(block_bytes_target // max(slab_bytes, 1), max_fused_slabs))
        tbh = pick_tbh(cap)
        if BH // tbh < 2 and BH > 1:
            smaller = pick_tbh(BH // 2)
            if smaller < BH:
                tbh = smaller

        block_rows = tbh * R
        grid = (BH // tbh,)

        cos_in = jnp.tile(cos2, (tbh, 1))            # (block_rows, L) f32
        sin_in = jnp.tile(sin2, (tbh, 1))

        qk_spec = pl.BlockSpec((block_rows, L), lambda i: (i, 0))
        cs_spec = pl.BlockSpec((block_rows, L), lambda i: (0, 0))
        p_spec = pl.BlockSpec((L, L), lambda i: (0, 0))

        kernel = rope_kernel_flat
        dims = ("parallel",)
        out_shape = (jax.ShapeDtypeStruct((BH * R, L), q.dtype),
                     jax.ShapeDtypeStruct((BH * R, L), k.dtype))

    # Advisory cost: the kernel is HBM-bandwidth-bound; matmul flops counted as
    # dense (that is what the MXU actually does with the permutation matrix).
    cost = pl.CostEstimate(
        flops=int(4 * BH * R * L * L + 6 * BH * R * L),
        transcendentals=0,
        bytes_accessed=int(4 * BH * R * L * itemsize
                           + cos_in.size * 4 + sin_in.size * 4
                           + L * L * itemsize),
    )

    grid_spec = pltpu.PrefetchScalarGridSpec(
        num_scalar_prefetch=0,
        grid=grid,
        in_specs=[cs_spec, cs_spec, p_spec, qk_spec, qk_spec],
        out_specs=[qk_spec, qk_spec],
    )

    q_emb, k_emb = pl.pallas_call(
        kernel,
        out_shape=out_shape,
        grid_spec=grid_spec,
        compiler_params=pltpu.CompilerParams(
            dimension_semantics=dims,
            # 32 MiB is the default scoped limit on v6e/v7x and a safe explicit
            # request on v5e (128 MiB physical); our pipelined footprint at the
            # 1 MiB block target is ~10 MiB.
            vmem_limit_bytes=32 * 1024 * 1024,
        ),
        cost_estimate=cost,
    )(cos_in, sin_in, P, q_in, k_in)

    return q_emb.reshape(B, H, S, D), k_emb.reshape(B, H, S, D)


# ---------------------------------------------------------------------------
# Pure-JAX reference (mirrors the PyTorch forward exactly)
# ---------------------------------------------------------------------------
def rope_reference(q, k, cos_cached, sin_cached, seq_len):
    cos = cos_cached[:seq_len].reshape(1, 1, seq_len, -1)
    sin = sin_cached[:seq_len].reshape(1, 1, seq_len, -1)

    def rotate_half(x):
        x1 = x[..., ::2]
        x2 = x[..., 1::2]
        return jnp.concatenate((-x2, x1), axis=-1)

    q_embed = q * cos + rotate_half(q) * sin
    k_embed = k * cos + rotate_half(k) * sin
    return q_embed, k_embed


if __name__ == "__main__":
    rope_fn = jax.jit(rope_forward, static_argnames=("seq_len",))
    key = jax.random.PRNGKey(0)

    # Case 1: small demo shape (exercises the flat fallback path).
    B, H, S, D = 2, 4, 8, 32
    max_seq_len, base = 2048, 10000
    kq, kk, key = jax.random.split(key, 3)
    q = jax.random.normal(kq, (B, H, S, D), dtype=jnp.float32)
    k = jax.random.normal(kk, (B, H, S, D), dtype=jnp.float32)
    cos_cached, sin_cached = compute_cos_sin_cache(max_seq_len, D, base)

    q_emb, k_emb = rope_fn(q, k, cos_cached, sin_cached, seq_len=S)
    jax.block_until_ready((q_emb, k_emb))
    q_ref, k_ref = rope_reference(q, k, cos_cached, sin_cached, seq_len=S)
    assert jnp.allclose(q_emb, q_ref, atol=1e-5, rtol=1e-5)
    assert jnp.allclose(k_emb, k_ref, atol=1e-5, rtol=1e-5)

    # Case 2: sublane-aligned shape (exercises the optimized 3-D slab path).
    B2, H2, S2, D2 = 2, 4, 64, 64
    kq2, kk2, key = jax.random.split(key, 3)
    q2 = jax.random.normal(kq2, (B2, H2, S2, D2), dtype=jnp.float32)
    k2 = jax.random.normal(kk2, (B2, H2, S2, D2), dtype=jnp.float32)
    cos_cached2, sin_cached2 = compute_cos_sin_cache(max_seq_len, D2, base)

    q_emb2, k_emb2 = rope_fn(q2, k2, cos_cached2, sin_cached2, seq_len=S2)
    jax.block_until_ready((q_emb2, k_emb2))
    q_ref2, k_ref2 = rope_reference(q2, k2, cos_cached2, sin_cached2, seq_len=S2)
    assert jnp.allclose(q_emb2, q_ref2, atol=1e-5, rtol=1e-5)
    assert jnp.allclose(k_emb2, k_ref2, atol=1e-5, rtol=1e-5)

    print("KERNEL_OK")
</pallas_src>

<mosaic_0001>
module attributes {stable_mosaic.version = 11 : i64} {
  func.func @rope_kernel_flat(%arg0: i32, %arg1: memref<8x128xf32, #tpu.memory_space<vmem>>, %arg2: memref<8x128xf32, #tpu.memory_space<vmem>>, %arg3: memref<128x128xf32, #tpu.memory_space<vmem>>, %arg4: memref<8x128xf32, #tpu.memory_space<vmem>>, %arg5: memref<8x128xf32, #tpu.memory_space<vmem>>, %arg6: memref<8x128xf32, #tpu.memory_space<vmem>>, %arg7: memref<8x128xf32, #tpu.memory_space<vmem>>) attributes {dimension_semantics = [#tpu.dimension_semantics<parallel>], iteration_bounds = array<i64: 2>, scalar_prefetch = 0 : i64, scratch_operands = 0 : i64, tpu.core_type = #tpu.core_type<tc>, window_params = [{pipeline_mode = #tpu.pipeline_mode<synchronous>, transform_indices = @transform_0, window_bounds = array<i64: 8, 128>}, {pipeline_mode = #tpu.pipeline_mode<synchronous>, transform_indices = @transform_1, window_bounds = array<i64: 8, 128>}, {pipeline_mode = #tpu.pipeline_mode<synchronous>, transform_indices = @transform_2, window_bounds = array<i64: 128, 128>}, {transform_indices = @transform_3, window_bounds = array<i64: 8, 128>}, {transform_indices = @transform_4, window_bounds = array<i64: 8, 128>}, {transform_indices = @transform_5, window_bounds = array<i64: 8, 128>}, {transform_indices = @transform_6, window_bounds = array<i64: 8, 128>}]} {
    %c0 = arith.constant 0 : index
    %c0_0 = arith.constant 0 : index
    %0 = vector.load %arg1[%c0, %c0_0] : memref<8x128xf32, #tpu.memory_space<vmem>>, vector<8x128xf32>
    %c0_1 = arith.constant 0 : index
    %c0_2 = arith.constant 0 : index
    %1 = vector.load %arg2[%c0_1, %c0_2] : memref<8x128xf32, #tpu.memory_space<vmem>>, vector<8x128xf32>
    %c0_3 = arith.constant 0 : index
    %c0_4 = arith.constant 0 : index
    %2 = vector.load %arg3[%c0_3, %c0_4] : memref<128x128xf32, #tpu.memory_space<vmem>>, vector<128x128xf32>
    %c0_5 = arith.constant 0 : index
    %c0_6 = arith.constant 0 : index
    %3 = vector.load %arg4[%c0_5, %c0_6] : memref<8x128xf32, #tpu.memory_space<vmem>>, vector<8x128xf32>
    %c0_7 = arith.constant 0 : index
    %c0_8 = arith.constant 0 : index
    %4 = vector.load %arg5[%c0_7, %c0_8] : memref<8x128xf32, #tpu.memory_space<vmem>>, vector<8x128xf32>
    %cst = arith.constant dense<0.000000e+00> : vector<8x128xf32>
    %5 = tpu.matmul %3, %2, %cst {dimension_numbers = #tpu.dot_dimension_numbers<[1], [0], [0], [1], [0, 0, 1, 1], [], []>} : vector<8x128xf32>, vector<128x128xf32>, vector<8x128xf32> -> vector<8x128xf32>
    %cst_9 = arith.constant dense<0.000000e+00> : vector<8x128xf32>
    %6 = tpu.matmul %4, %2, %cst_9 {dimension_numbers = #tpu.dot_dimension_numbers<[1], [0], [0], [1], [0, 0, 1, 1], [], []>} : vector<8x128xf32>, vector<128x128xf32>, vector<8x128xf32> -> vector<8x128xf32>
    %7 = arith.mulf %3, %0 : vector<8x128xf32>
    %8 = arith.mulf %5, %1 : vector<8x128xf32>
    %9 = arith.addf %7, %8 : vector<8x128xf32>
    %c0_10 = arith.constant 0 : index
    %c0_11 = arith.constant 0 : index
    %10 = vector.load %arg6[%c0_10, %c0_11] : memref<8x128xf32, #tpu.memory_space<vmem>>, vector<8x128xf32>
    tpu.vector_store %arg6[%c0_10, %c0_11], %9 {strides = array<i32>} : memref<8x128xf32, #tpu.memory_space<vmem>>, vector<8x128xf32>,
    %11 = arith.mulf %4, %0 : vector<8x128xf32>
    %12 = arith.mulf %6, %1 : vector<8x128xf32>
    %13 = arith.addf %11, %12 : vector<8x128xf32>
    %c0_12 = arith.constant 0 : index
    %c0_13 = arith.constant 0 : index
    %14 = vector.load %arg7[%c0_12, %c0_13] : memref<8x128xf32, #tpu.memory_space<vmem>>, vector<8x128xf32>
    tpu.vector_store %arg7[%c0_12, %c0_13], %13 {strides = array<i32>} : memref<8x128xf32, #tpu.memory_space<vmem>>, vector<8x128xf32>,
    return
  }
  func.func @transform_0(%arg0: i32) -> (i32, i32) {
    %c0_i32 = arith.constant 0 : i32
    %c0_i32_0 = arith.constant 0 : i32
    %c0_i32_1 = arith.constant 0 : i32
    return %c0_i32, %c0_i32_0 : i32, i32
  }
  func.func @transform_1(%arg0: i32) -> (i32, i32) {
    %c0_i32 = arith.constant 0 : i32
    %c0_i32_0 = arith.constant 0 : i32
    %c0_i32_1 = arith.constant 0 : i32
    return %c0_i32, %c0_i32_0 : i32, i32
  }
  func.func @transform_2(%arg0: i32) -> (i32, i32) {
    %c0_i32 = arith.constant 0 : i32
    %c0_i32_0 = arith.constant 0 : i32
    %c0_i32_1 = arith.constant 0 : i32
    return %c0_i32, %c0_i32_0 : i32, i32
  }
  func.func @transform_3(%arg0: i32) -> (i32, i32) {
    %c0_i32 = arith.constant 0 : i32
    %c0_i32_0 = arith.constant 0 : i32
    return %arg0, %c0_i32 : i32, i32
  }
  func.func @transform_4(%arg0: i32) -> (i32, i32) {
    %c0_i32 = arith.constant 0 : i32
    %c0_i32_0 = arith.constant 0 : i32
    return %arg0, %c0_i32 : i32, i32
  }
  func.func @transform_5(%arg0: i32) -> (i32, i32) {
    %c0_i32 = arith.constant 0 : i32
    %c0_i32_0 = arith.constant 0 : i32
    return %arg0, %c0_i32 : i32, i32
  }
  func.func @transform_6(%arg0: i32) -> (i32, i32) {
    %c0_i32 = arith.constant 0 : i32
    %c0_i32_0 = arith.constant 0 : i32
    return %arg0, %c0_i32 : i32, i32
  }
}

</mosaic_0001>

<bundles_post_ra>
// kernel: rope_forward.1
= control target key start
LH: loop header
LB: loop body
LE: loop exit
PB: predicated region body
PF: predicated region fallthrough
CT: control target
= control target key end

     0   :  { %s501_s21 = smov 0   ;;  %s588_s0 = inlined_call_operand.vmem [shape: f32[8,128], index: 0, kind: input, shape index: {}]   ;;  %s589_s1 = inlined_call_operand.vmem [shape: f32[8,128], index: 1, kind: input, shape index: {}]   ;;  %s590_s2 = inlined_call_operand.vmem [shape: f32[128,128], index: 2, kind: input, shape index: {}]   ;;  %s591_s3 = inlined_call_operand.vmem [shape: f32[16,128], index: 3, kind: input, shape index: {}]   ;;  %s592_s4 = inlined_call_operand.vmem [shape: f32[16,128], index: 4, kind: input, shape index: {}]   ;;  %s593_s5 = inlined_call_operand.vmem [shape: f32[16,128], index: 5, kind: output, shape index: {0}]   ;;  %s594_s6 = inlined_call_operand.vmem [shape: f32[16,128], index: 6, kind: output, shape index: {1}]  }
   0x1 LB: > { %s439_s22 = sadd.s32 4294967295, %s464_s21   ;;  %p443_p0 = scmp.ge.s32.totalorder %s464_s21, 1  ;;  %s464_s21 = sphi %s501_s21, %s17_s21  }
   0x2   : > { %p223_p1 = scmp.lt.s32.totalorder %s464_s21, 3 }
   0x4   : > { %p224_p2 = pnand %p443_p0, %p223_p1 }
   0x5   : > { %p259_p3 = scmp.lt.s32.totalorder (!%p224_p2), %s439_s22, 1 }
   0x6   : > { %227 = sbr.rel (%p224_p2) target bundleno = 175 (0xaf), region = 40 }
   0xb   : > { %v292_v0 = vld [vmem:[%s590_s2 + $0x78] sm:$0xff]  ;;  %v291_v1 = vld [vmem:[%s590_s2 + $0x70] sm:$0xff]  ;;  %v290_v2 = vld [vmem:[%s590_s2 + $0x68] sm:$0xff]  ;;  %s596_s22 = smov (!%p259_p3, %s439_s22), 1 }
   0xc   : > { %295 = vmatpush.msra.mxu0 %v292_v0  ;;  %315 = vmatpush.msra.mxu1 %v292_v0  ;;  %v289_v3 = vld [vmem:[%s590_s2 + $0x60] sm:$0xff]  ;;  %v288_v4 = vld [vmem:[%s590_s2 + $0x58] sm:$0xff]  ;;  %v287_v5 = vld [vmem:[%s590_s2 + $0x50] sm:$0xff]  ;;  %s552_s27 = sshll.u32 %s596_s22, 3 }
   0xd   : > { %v286_v6 = vld [vmem:[%s590_s2 + $0x48] sm:$0xff]  ;;  %v285_v7 = vld [vmem:[%s590_s2 + $0x40] sm:$0xff]  ;;  %v284_v8 = vld [vmem:[%s590_s2 + $0x38] sm:$0xff]  ;;  %s262_s10 = scalar_lea.vmem %s591_s3, %s552_s27  ;;  %s266_s22 = scalar_lea.vmem %s592_s4, %s552_s27 }
   0xe   : > { %296 = vmatpush.msra.mxu0 %v291_v1  ;;  %316 = vmatpush.msra.mxu1 %v291_v1  ;;  %v283_v9 = vld [vmem:[%s590_s2 + $0x30] sm:$0xff]  ;;  %v282_v10 = vld [vmem:[%s590_s2 + $0x28] sm:$0xff]  ;;  %v281_v11 = vld [vmem:[%s590_s2 + $0x20] sm:$0xff]  ;;  %s270_s23 = scalar_lea.vmem %s593_s5, %s552_s27  ;;  %s274_s26 = scalar_lea.vmem %s594_s6, %s552_s27 }
   0xf   : > { %v280_v12 = vld [vmem:[%s590_s2 + $0x18] sm:$0xff]  ;;  %v279_v13 = vld [vmem:[%s590_s2 + $0x10] sm:$0xff]  ;;  %v278_v14 = vld [vmem:[%s590_s2 + $0x8] sm:$0xff] }
  0x10   : > { %297 = vmatpush.msra.mxu0 %v290_v2  ;;  %317 = vmatpush.msra.mxu1 %v290_v2  ;;  %v277_v15 = vld [vmem:[%s590_s2] sm:$0xff] }
  0x11   : > { %v293_v16 = vld [vmem:[%s262_s10] sm:$0xff] }
  0x12   : > { %298 = vmatpush.msra.mxu0 %v289_v3  ;;  %318 = vmatpush.msra.mxu1 %v289_v3  ;;  %v294_v17 = vld [vmem:[%s266_s22] sm:$0xff] }
  0x13   : > { %v275_v18 = vld [vmem:[%s588_s0] sm:$0xff] }
  0x14   : > { %299 = vmatpush.msra.mxu0 %v288_v4  ;;  %319 = vmatpush.msra.mxu1 %v288_v4  ;;  %v276_v19 = vld [vmem:[%s589_s1] sm:$0xff]  ;;  %v335_v20 = vmul.f32 %v293_v16, %v275_v18  ;;  %v339_v21 = vmul.f32 %v294_v17, %v275_v18 }
  0x16   : > { %300 = vmatpush.msra.mxu0 %v287_v5  ;;  %320 = vmatpush.msra.mxu1 %v287_v5 }
  0x18   : > { %301 = vmatpush.msra.mxu0 %v286_v6  ;;  %321 = vmatpush.msra.mxu1 %v286_v6 }
  0x1a   : > { %302 = vmatpush.msra.mxu0 %v285_v7  ;;  %322 = vmatpush.msra.mxu1 %v285_v7 }
  0x1c   : > { %303 = vmatpush.msra.mxu0 %v284_v8  ;;  %323 = vmatpush.msra.mxu1 %v284_v8 }
  0x1e   : > { %304 = vmatpush.msra.mxu0 %v283_v9  ;;  %324 = vmatpush.msra.mxu1 %v283_v9 }
  0x20   : > { %305 = vmatpush.msra.mxu0 %v282_v10  ;;  %325 = vmatpush.msra.mxu1 %v282_v10 }
  0x22   : > { %306 = vmatpush.msra.mxu0 %v281_v11  ;;  %326 = vmatpush.msra.mxu1 %v281_v11 }
  0x24   : > { %307 = vmatpush.msra.mxu0 %v280_v12  ;;  %327 = vmatpush.msra.mxu1 %v280_v12 }
  0x26   : > { %308 = vmatpush.msra.mxu0 %v279_v13  ;;  %328 = vmatpush.msra.mxu1 %v279_v13 }
  0x28   : > { %309 = vmatpush.msra.mxu0 %v278_v14  ;;  %329 = vmatpush.msra.mxu1 %v278_v14 }
  0x2a   : > { %310 = vmatpush.msra.mxu0 %v277_v15  ;;  %330 = vmatpush.msra.mxu1 %v277_v15 }
  0x2b   : > { %311 = vmatmul.f32.vlgmr.msra.gmra.mxu0 %v293_v16  ;;  %331 = vmatmul.f32.vlgmr.msra.gmra.mxu1 %v294_v17 }
  0xa8   : > { %v312_v22 = vpop.f32.mrf.mxu0  ;;  %v332_v23 = vpop.f32.mrf.mxu1 }
  0xa9   : > { %v336_v24 = vmul.f32 %v312_v22, %v276_v19  ;;  %v340_v25 = vmul.f32 %v332_v23, %v276_v19 }
  0xab   : > { %v337_v26 = vadd.f32 %v336_v24, %v335_v20  ;;  %v341_v27 = vadd.f32 %v340_v25, %v339_v21 }
  0xad   : > { %338 = vst [vmem:[%s270_s23] sm:$0xff] %v337_v26 }
  0xae   : > { %342 = vst [vmem:[%s274_s26] sm:$0xff] %v341_v27 }
  0xaf PF: > { %s17_s21 = sadd.s32 1, %s464_s21  }
  0xb0   : > { %p14_p4 = scmp.ge.s32.totalorder %s17_s21, 4  }
  0xb2   :  { %16 = sbr.rel (!%p14_p4) target bundleno = 1 (0x1), region = 85 }

</bundles_post_ra>
